<compile_context>
chip_gen: v5e
topology: v5e:2x2
jax: 0.10.0
libtpu: 0.0.40
codegen_flags: <defaults>
</compile_context>

<pallas_src>
from functools import partial

import jax
import jax.numpy as jnp
from jax.experimental import pallas as pl
from jax.experimental.pallas import tpu as pltpu

H1, H2, OUT = 128, 64, 2
LANE, SUBLANE = 128, 8
H2P = 128          # hidden-2 kept lane-dense inside the kernel (zero padded)
W3N = 128          # w3 lane-padded for the MXU; only [:, :OUT] is stored


def _round_up(x, m):
    return (x + m - 1) // m * m


def _cdiv(a, b):
    return -(-a // b)


def mlp_kernel(x_ref, w1_ref, w2_ref, w3_ref, b_ref, o_ref):
    # bf16 operands on the MXU, f32 accumulation; bias-add / ReLU in f32 (VPU).
    x = x_ref[...].astype(jnp.bfloat16)              # (tm, D)

    h1 = jnp.dot(x, w1_ref[...], preferred_element_type=jnp.float32)
    h1 = jnp.maximum(h1 + b_ref[0:1, :], 0.0)        # (tm, 128)

    h2 = jnp.dot(h1.astype(jnp.bfloat16), w2_ref[...],
                 preferred_element_type=jnp.float32)
    h2 = jnp.maximum(h2 + b_ref[1:2, :], 0.0)        # (tm, 128), lanes 64.. are 0

    y = jnp.dot(h2.astype(jnp.bfloat16), w3_ref[...],
                preferred_element_type=jnp.float32) + b_ref[2:3, :]
    o_ref[...] = y[:, :OUT].astype(o_ref.dtype)      # store only the 2 real lanes


def prepare_params(params):
    """One-time weight prep: zero-pad narrow dims, cast to bf16, pack biases.

    Hoisted out of the per-call path so the forward pass does no weight
    massaging (pure kernel launch + tiny slice)."""
    w1, b1 = params["w1"], params["b1"]
    w2, b2 = params["w2"], params["b2"]
    w3, b3 = params["w3"], params["b3"]
    D = w1.shape[0]

    w2p = jnp.zeros((H1, H2P), jnp.float32).at[:, :H2].set(w2)
    w3p = jnp.zeros((H2P, W3N), jnp.float32).at[:H2, :OUT].set(w3)

    # Single packed bias tile: row0 = b1, row1 = b2 (zero padded), row2 = b3.
    bias = jnp.zeros((SUBLANE, LANE), jnp.float32)
    bias = bias.at[0, :H1].set(b1.reshape(-1))
    bias = bias.at[1, :H2].set(b2.reshape(-1))
    bias = bias.at[2, :OUT].set(b3.reshape(-1))

    return {
        "D": D,
        "w1": w1.astype(jnp.bfloat16),               # (D, 128)
        "w2": w2p.astype(jnp.bfloat16),              # (128, 128)
        "w3": w3p.astype(jnp.bfloat16),              # (128, 128)
        "bias": bias,                                # (8, 128) f32
    }


@partial(jax.jit, static_argnames=("tm",))
def mlp_forward(x, prepared, *, tm=1024):
    """x: (B, D) f32. prepared: output of prepare_params(). Returns (B, 2)."""
    B, D = x.shape
    w1, w2, w3, bias = prepared["w1"], prepared["w2"], prepared["w3"], prepared["bias"]

    # Pad batch only to a sublane multiple (<= 7 wasted rows, only when ragged).
    Bp = _round_up(B, SUBLANE)
    xp = x if Bp == B else jnp.zeros((Bp, D), x.dtype).at[:B, :].set(x)

    # Tile choice: big tiles for DMA efficiency, but aim for >= 2 grid steps so
    # the "parallel" batch axis can be split across v7x's 2 TensorCores.
    tm_eff = max(SUBLANE, min(tm, _round_up(_cdiv(Bp, 2), SUBLANE)))
    grid_m = _cdiv(Bp, tm_eff)

    full = lambda i: (0, 0)

    flops = 2 * Bp * (D * H1 + H1 * H2P + H2P * W3N)
    bytes_accessed = (xp.size * 4 + w1.size * 2 + w2.size * 2 + w3.size * 2
                      + bias.size * 4 + Bp * OUT * 4)
    cost = pl.CostEstimate(flops=flops, transcendentals=0,
                           bytes_accessed=bytes_accessed)

    out_padded = pl.pallas_call(
        mlp_kernel,
        out_shape=jax.ShapeDtypeStruct((Bp, OUT), x.dtype),
        grid_spec=pltpu.PrefetchScalarGridSpec(
            num_scalar_prefetch=0,
            grid=(grid_m,),
            in_specs=[
                pl.BlockSpec((tm_eff, D), lambda i: (i, 0)),   # x tile (f32)
                pl.BlockSpec((D, H1), full),                   # w1 bf16
                pl.BlockSpec((H1, H2P), full),                 # w2 bf16 (padded)
                pl.BlockSpec((H2P, W3N), full),                # w3 bf16 (padded)
                pl.BlockSpec((SUBLANE, LANE), full),           # packed biases
            ],
            out_specs=pl.BlockSpec((tm_eff, OUT), lambda i: (i, 0)),
        ),
        compiler_params=pltpu.CompilerParams(
            dimension_semantics=("parallel",),
        ),
        cost_estimate=cost,
    )(xp, w1, w2, w3, bias)

    return out_padded[:B, :]


def init_params(key, input_dim):
    """Deterministic init mimicking nn.Linear default (uniform +/- 1/sqrt(fan_in))."""
    ks = jax.random.split(key, 6)

    def lin(kw, kb, fan_in, fan_out):
        bound = 1.0 / jnp.sqrt(fan_in)
        w = jax.random.uniform(kw, (fan_in, fan_out), jnp.float32, -bound, bound)
        b = jax.random.uniform(kb, (fan_out,), jnp.float32, -bound, bound)
        return w, b

    w1, b1 = lin(ks[0], ks[1], input_dim, H1)
    w2, b2 = lin(ks[2], ks[3], H1, H2)
    w3, b3 = lin(ks[4], ks[5], H2, OUT)
    return {"w1": w1, "b1": b1, "w2": w2, "b2": b2, "w3": w3, "b3": b3}


def mlp_reference(x, p):
    h1 = jnp.maximum(x @ p["w1"] + p["b1"], 0.0)
    h2 = jnp.maximum(h1 @ p["w2"] + p["b2"], 0.0)
    return h2 @ p["w3"] + p["b3"]


if __name__ == "__main__":
    key = jax.random.PRNGKey(0)
    k_x, k_x2, k_p = jax.random.split(key, 3)

    batch, input_dim = 8, 32
    x = jax.random.normal(k_x, (batch, input_dim), jnp.float32)
    params = init_params(k_p, input_dim)
    prepared = prepare_params(params)           # hoisted, done once

    out = jax.block_until_ready(mlp_forward(x, prepared))
    ref = mlp_reference(x, params)
    assert out.shape == (batch, 2), out.shape
    # bf16 MXU inputs -> relaxed tolerance vs. the f32 reference.
    assert jnp.allclose(out, ref, atol=2e-2, rtol=2e-2), "mismatch vs reference"

    # Ragged batch (exercises the sublane-padding path).
    x2 = jax.random.normal(k_x2, (12, input_dim), jnp.float32)
    out2 = jax.block_until_ready(mlp_forward(x2, prepared))
    ref2 = mlp_reference(x2, params)
    assert out2.shape == (12, 2), out2.shape
    assert jnp.allclose(out2, ref2, atol=2e-2, rtol=2e-2), "mismatch (ragged batch)"

    print("KERNEL_OK")
</pallas_src>

<mosaic_0001>
module attributes {stable_mosaic.version = 11 : i64} {
  func.func @mlp_kernel(%arg0: i32, %arg1: memref<8x32xf32, #tpu.memory_space<vmem>>, %arg2: memref<32x128xbf16, #tpu.memory_space<vmem>>, %arg3: memref<128x128xbf16, #tpu.memory_space<vmem>>, %arg4: memref<128x128xbf16, #tpu.memory_space<vmem>>, %arg5: memref<8x128xf32, #tpu.memory_space<vmem>>, %arg6: memref<8x2xf32, #tpu.memory_space<vmem>>) attributes {dimension_semantics = [#tpu.dimension_semantics<parallel>], iteration_bounds = array<i64: 1>, scalar_prefetch = 0 : i64, scratch_operands = 0 : i64, tpu.core_type = #tpu.core_type<tc>, window_params = [{transform_indices = @transform_0, window_bounds = array<i64: 8, 32>}, {pipeline_mode = #tpu.pipeline_mode<synchronous>, transform_indices = @transform_1, window_bounds = array<i64: 32, 128>}, {pipeline_mode = #tpu.pipeline_mode<synchronous>, transform_indices = @transform_2, window_bounds = array<i64: 128, 128>}, {pipeline_mode = #tpu.pipeline_mode<synchronous>, transform_indices = @transform_3, window_bounds = array<i64: 128, 128>}, {pipeline_mode = #tpu.pipeline_mode<synchronous>, transform_indices = @transform_4, window_bounds = array<i64: 8, 128>}, {transform_indices = @transform_5, window_bounds = array<i64: 8, 2>}]} {
    %c0 = arith.constant 0 : index
    %c0_0 = arith.constant 0 : index
    %0 = vector.load %arg1[%c0, %c0_0] : memref<8x32xf32, #tpu.memory_space<vmem>>, vector<8x32xf32>
    %1 = arith.truncf %0 : vector<8x32xf32> to vector<8x32xbf16>
    %c0_1 = arith.constant 0 : index
    %c0_2 = arith.constant 0 : index
    %2 = vector.load %arg2[%c0_1, %c0_2] : memref<32x128xbf16, #tpu.memory_space<vmem>>, vector<32x128xbf16>
    %cst = arith.constant dense<0.000000e+00> : vector<8x128xf32>
    %3 = tpu.matmul %1, %2, %cst {dimension_numbers = #tpu.dot_dimension_numbers<[1], [0], [0], [1], [0, 0, 1, 1], [], []>} : vector<8x32xbf16>, vector<32x128xbf16>, vector<8x128xf32> -> vector<8x128xf32>
    %c0_3 = arith.constant 0 : index
    %c0_4 = arith.constant 0 : index
    %4 = vector.load %arg5[%c0_3, %c0_4] : memref<8x128xf32, #tpu.memory_space<vmem>>, vector<1x128xf32>
    %5 = vector.broadcast %4 : vector<1x128xf32> to vector<8x128xf32>
    %6 = arith.addf %3, %5 : vector<8x128xf32>
    %cst_5 = arith.constant 0.000000e+00 : f32
    %7 = vector.broadcast %cst_5 : f32 to vector<8x128xf32>
    %8 = arith.maximumf %6, %7 : vector<8x128xf32>
    %9 = arith.truncf %8 : vector<8x128xf32> to vector<8x128xbf16>
    %c0_6 = arith.constant 0 : index
    %c0_7 = arith.constant 0 : index
    %10 = vector.load %arg3[%c0_6, %c0_7] : memref<128x128xbf16, #tpu.memory_space<vmem>>, vector<128x128xbf16>
    %cst_8 = arith.constant dense<0.000000e+00> : vector<8x128xf32>
    %11 = tpu.matmul %9, %10, %cst_8 {dimension_numbers = #tpu.dot_dimension_numbers<[1], [0], [0], [1], [0, 0, 1, 1], [], []>} : vector<8x128xbf16>, vector<128x128xbf16>, vector<8x128xf32> -> vector<8x128xf32>
    %c1 = arith.constant 1 : index
    %c0_9 = arith.constant 0 : index
    %12 = vector.load %arg5[%c1, %c0_9] : memref<8x128xf32, #tpu.memory_space<vmem>>, vector<1x128xf32>
    %13 = vector.broadcast %12 : vector<1x128xf32> to vector<8x128xf32>
    %14 = arith.addf %11, %13 : vector<8x128xf32>
    %cst_10 = arith.constant 0.000000e+00 : f32
    %15 = vector.broadcast %cst_10 : f32 to vector<8x128xf32>
    %16 = arith.maximumf %14, %15 : vector<8x128xf32>
    %17 = arith.truncf %16 : vector<8x128xf32> to vector<8x128xbf16>
    %c0_11 = arith.constant 0 : index
    %c0_12 = arith.constant 0 : index
    %18 = vector.load %arg4[%c0_11, %c0_12] : memref<128x128xbf16, #tpu.memory_space<vmem>>, vector<128x128xbf16>
    %cst_13 = arith.constant dense<0.000000e+00> : vector<8x128xf32>
    %19 = tpu.matmul %17, %18, %cst_13 {dimension_numbers = #tpu.dot_dimension_numbers<[1], [0], [0], [1], [0, 0, 1, 1], [], []>} : vector<8x128xbf16>, vector<128x128xbf16>, vector<8x128xf32> -> vector<8x128xf32>
    %c2 = arith.constant 2 : index
    %c0_14 = arith.constant 0 : index
    %20 = vector.load %arg5[%c2, %c0_14] : memref<8x128xf32, #tpu.memory_space<vmem>>, vector<1x128xf32>
    %21 = vector.broadcast %20 : vector<1x128xf32> to vector<8x128xf32>
    %22 = arith.addf %19, %21 : vector<8x128xf32>
    %23 = vector.extract_strided_slice %22 {offsets = [0, 0], sizes = [8, 2], strides = [1, 1]} : vector<8x128xf32> to vector<8x2xf32>
    %c0_15 = arith.constant 0 : index
    %c0_16 = arith.constant 0 : index
    %24 = vector.load %arg6[%c0_15, %c0_16] : memref<8x2xf32, #tpu.memory_space<vmem>>, vector<8x2xf32>
    tpu.vector_store %arg6[%c0_15, %c0_16], %23 {strides = array<i32>} : memref<8x2xf32, #tpu.memory_space<vmem>>, vector<8x2xf32>,
    return
  }
  func.func @transform_0(%arg0: i32) -> (i32, i32) {
    %c0_i32 = arith.constant 0 : i32
    %c0_i32_0 = arith.constant 0 : i32
    return %arg0, %c0_i32 : i32, i32
  }
  func.func @transform_1(%arg0: i32) -> (i32, i32) {
    %c0_i32 = arith.constant 0 : i32
    %c0_i32_0 = arith.constant 0 : i32
    %c0_i32_1 = arith.constant 0 : i32
    return %c0_i32, %c0_i32_0 : i32, i32
  }
  func.func @transform_2(%arg0: i32) -> (i32, i32) {
    %c0_i32 = arith.constant 0 : i32
    %c0_i32_0 = arith.constant 0 : i32
    %c0_i32_1 = arith.constant 0 : i32
    return %c0_i32, %c0_i32_0 : i32, i32
  }
  func.func @transform_3(%arg0: i32) -> (i32, i32) {
    %c0_i32 = arith.constant 0 : i32
    %c0_i32_0 = arith.constant 0 : i32
    %c0_i32_1 = arith.constant 0 : i32
    return %c0_i32, %c0_i32_0 : i32, i32
  }
  func.func @transform_4(%arg0: i32) -> (i32, i32) {
    %c0_i32 = arith.constant 0 : i32
    %c0_i32_0 = arith.constant 0 : i32
    %c0_i32_1 = arith.constant 0 : i32
    return %c0_i32, %c0_i32_0 : i32, i32
  }
  func.func @transform_5(%arg0: i32) -> (i32, i32) {
    %c0_i32 = arith.constant 0 : i32
    %c0_i32_0 = arith.constant 0 : i32
    return %arg0, %c0_i32 : i32, i32
  }
}

</mosaic_0001>

<bundles_post_ra>
// kernel: mlp_forward.1
= control target key start
LH: loop header
LB: loop body
LE: loop exit
PB: predicated region body
PF: predicated region fallthrough
CT: control target
= control target key end

     0   :  { %10 = vsyncpa [#allocation3], 0  ;;  %s585_s0 = inlined_call_operand.hbm [shape: f32[8,32], index: 0, kind: input, shape index: {}]   ;;  %s586_s1 = inlined_call_operand.hbm [shape: bf16[32,128], index: 1, kind: input, shape index: {}]   ;;  %s587_s2 = inlined_call_operand.hbm [shape: bf16[128,128], index: 2, kind: input, shape index: {}]   ;;  %s588_s3 = inlined_call_operand.hbm [shape: bf16[128,128], index: 3, kind: input, shape index: {}]   ;;  %s589_s4 = inlined_call_operand.hbm [shape: f32[8,128], index: 4, kind: input, shape index: {}]   ;;  %s590_s5 = inlined_call_operand.vmem [shape: f32[8,2], index: 5, kind: output, shape index: {}]  }
   0x1   :  { %11 = vsyncpa [#allocation5], 0  ;;  %s28_s20 = sshll.u32 %s586_s1, 4  ;;  %s29_s20 = int_to_ptr.hbm [resolvable:$true] %s28_s20 }
   0x2   :  { %12 = vsyncpa [#allocation8], 0  ;;  %s530_s21 = smov [#allocation4]   ;;  %s54_s25 = sshll.u32 %s588_s3, 4  ;;  %s55_s25 = int_to_ptr.hbm [resolvable:$true] %s54_s25 }
   0x3   :  { %s30_s22 = sshll.u32 %s530_s21, 4  ;;  %s531_s26 = smov 64   ;;  %s31_s22 = int_to_ptr.vmem [resolvable:$true] %s30_s22 }
   0x4   :  { %s532_s27 = smov 4   ;;  %s533_s28 = smov [#allocation7]  }
   0x5   :  { %36 = dma.hbm_to_vmem [thread:$0]  %s29_s20, 256, %s31_s22, [#allocation5], %s531_s26, %s531_s26, %s532_s27  }
   0x6   :  { %s56_s29 = sshll.u32 %s533_s28, 4  ;;  %s18_s7 = sshll.u32 %s585_s0, 4  ;;  %s57_s29 = int_to_ptr.vmem [resolvable:$true] %s56_s29  ;;  %s19_s7 = int_to_ptr.hbm [resolvable:$true] %s18_s7 }
   0x7   :  { %62 = dma.hbm_to_vmem [thread:$0]  %s55_s25, 1024, %s57_s29, [#allocation8], %s531_s26, %s531_s26, %s532_s27  }
   0x8   :  { %s41_s9 = sshll.u32 %s587_s2, 4  ;;  %s534_s10 = smov [#allocation2]   ;;  %s42_s9 = int_to_ptr.hbm [resolvable:$true] %s41_s9 }
   0x9   :  { %s20_s11 = sshll.u32 %s534_s10, 4  ;;  %s535_s3 = smov [#allocation6]   ;;  %s21_s11 = int_to_ptr.vmem [resolvable:$true] %s20_s11 }
   0xa   :  { %23 = dma.hbm_to_vmem [thread:$0]  %s19_s7, 128, %s21_s11, [#allocation3]  }
   0xb   :  { %s43_s12 = sshll.u32 %s535_s3, 4  ;;  %s68_s15 = sshll.u32 %s589_s4, 4  ;;  %s44_s12 = int_to_ptr.vmem [resolvable:$true] %s43_s12  ;;  %s69_s15 = int_to_ptr.hbm [resolvable:$true] %s68_s15 }
   0xc   :  { %49 = dma.hbm_to_vmem [thread:$0]  %s42_s9, 1024, %s44_s12, [#allocation5], %s531_s26, %s531_s26, %s532_s27  }
   0xd   :  { %s536_s0 = smov [#allocation9]  }
   0xe   :  { %s70_s16 = sshll.u32 %s536_s0, 4  ;;  %s71_s16 = int_to_ptr.vmem [resolvable:$true] %s70_s16 }
   0xf   :  { %73 = dma.hbm_to_vmem [thread:$0]  %s69_s15, 128, %s71_s16, [#allocation8]  }
  0x10   :  { %524 = dma.done.wait [#allocation3], 128  }
  0x11   :  { %525 = vsyncadd [#allocation3], 4294967168 }
  0x12   :  { %526 = dma.done.wait [#allocation5], 1280  }
  0x13   :  { %527 = vsyncadd [#allocation5], 4294966016 }
  0x14   :  { %528 = dma.done.wait [#allocation8], 1152  }
  0x15   :  { %529 = vsyncadd [#allocation8], 4294966144  ;;  %v377_v0 = vld [vmem:[#allocation4 + $0x8] sm:$0xff]  ;;  %v376_v2 = vld [vmem:[#allocation4] sm:$0xff]  ;;  %vm115_vm0 = vcmask 261120   ;;  %vm294_vm1 = vcmask 15360  }
  0x16   :  { %v385_v1 = vld [vmem:[#allocation6 + $0x38] sm:$0xff]  ;;  %125 = vmatpush.bf16.msra.mxu0 %v377_v0  ;;  %v95_v3 = vld [vmem:[#allocation2] sm:$0xff]  ;;  %v384_v4 = vld [vmem:[#allocation6 + $0x30] sm:$0xff] }
  0x17   :  { %200 = vmatpush.bf16.msra.mxu1 %v385_v1  ;;  %v96_v5 = vpack.c.bf16 %v95_v3, %v95_v3  ;;  %v383_v6 = vld [vmem:[#allocation6 + $0x28] sm:$0xff]  ;;  %v382_v7 = vld [vmem:[#allocation6 + $0x20] sm:$0xff]  ;;  %v381_v8 = vld [vmem:[#allocation6 + $0x18] sm:$0xff] }
  0x18   :  { %v380_v9 = vld [vmem:[#allocation6 + $0x10] sm:$0xff]  ;;  %v379_v10 = vld [vmem:[#allocation6 + $0x8] sm:$0xff]  ;;  %v378_v11 = vld [vmem:[#allocation6] sm:$0xff] }
  0x19   :  { %v393_v12 = vld [vmem:[#allocation7 + $0x38] sm:$0xff]  ;;  %v392_v13 = vld [vmem:[#allocation7 + $0x30] sm:$0xff]  ;;  %v391_v14 = vld [vmem:[#allocation7 + $0x28] sm:$0xff] }
  0x1a   :  { %126 = vmatpush.bf16.msra.mxu0 %v376_v2  ;;  %281 = vmatpush.bf16.msra.mxu2 %v393_v12  ;;  %v390_v15 = vld [vmem:[#allocation7 + $0x20] sm:$0xff]  ;;  %v389_v16 = vld [vmem:[#allocation7 + $0x18] sm:$0xff]  ;;  %v388_v17 = vld [vmem:[#allocation7 + $0x10] sm:$0xff] }
  0x1b   :  { %201 = vmatpush.bf16.msra.mxu1 %v384_v4  ;;  %v401_v18 = vld [vmem:[#allocation9] ss:$0 sm:$0xff]  ;;  %v387_v24 = vld [vmem:[#allocation7 + $0x8] sm:$0xff]  ;;  %v402_v26 = vld [vmem:[#allocation9 + $0x1] ss:$0 sm:$0xff] }
  0x1c   :  { %v386_v25 = vld [vmem:[#allocation7] sm:$0xff] }
  0x1d   :  { %311 = vmatmul.msk.bf16.vlgmr.msra.gmra.mxu0 %vm115_vm0, %v96_v5  ;;  %v403_v32 = vld [vmem:[#allocation9 + $0x2] ss:$0 sm:$0xff] }
  0x1e   :  { %282 = vmatpush.bf16.msra.mxu2 %v392_v13 }
  0x1f   :  { %202 = vmatpush.bf16.msra.mxu1 %v383_v6 }
  0x22   :  { %283 = vmatpush.bf16.msra.mxu2 %v391_v14 }
  0x23   :  { %203 = vmatpush.bf16.msra.mxu1 %v382_v7 }
  0x26   :  { %284 = vmatpush.bf16.msra.mxu2 %v390_v15 }
  0x27   :  { %204 = vmatpush.bf16.msra.mxu1 %v381_v8 }
  0x2a   :  { %285 = vmatpush.bf16.msra.mxu2 %v389_v16 }
  0x2b   :  { %205 = vmatpush.bf16.msra.mxu1 %v380_v9 }
  0x2e   :  { %286 = vmatpush.bf16.msra.mxu2 %v388_v17 }
  0x2f   :  { %206 = vmatpush.bf16.msra.mxu1 %v379_v10 }
  0x32   :  { %287 = vmatpush.bf16.msra.mxu2 %v387_v24 }
  0x33   :  { %207 = vmatpush.bf16.msra.mxu1 %v378_v11 }
  0x36   :  { %288 = vmatpush.bf16.msra.mxu2 %v386_v25 }
  0x9a   :  { %v128_v19 = vpop.f32.mrf.mxu0 }
  0x9b   :  { %v129_v20 = vadd.f32 %v401_v18, %v128_v19 }
  0x9d   :  { %v132_v21 = vmax.f32 %v129_v20, 0.0 }
  0x9f   :  { %v133_v22 = vpack.c.bf16 %v132_v21, %v132_v21 }
  0xa1   :  { %208 = vmatmul.bf16.vlgmr.msra.gmra.mxu1 %v133_v22 }
  0xa2   :  { %v130_v23 = vpop.f32.mrf.mxu0 }
 0x11e   :  { %v209_v27 = vpop.f32.mrf.mxu1 }
 0x11f   :  { %v210_v28 = vadd.f32 %v402_v26, %v209_v27 }
 0x121   :  { %v213_v29 = vmax.f32 %v210_v28, 0.0 }
 0x123   :  { %v214_v30 = vpack.c.bf16 %v213_v29, %v213_v29 }
 0x125   :  { %289 = vmatmul.bf16.vlgmr.msra.gmra.mxu2 %v214_v30 }
 0x126   :  { %v211_v31 = vpop.f32.mrf.mxu1 }
 0x1a8   :  { %v290_v33 = vpop.f32.mrf.mxu2 }
 0x1a9   :  { %v291_v34 = vadd.f32 %v403_v32, %v290_v33 }
 0x1ab   :  { %295 = vst.msk [vmem:[%s590_s5] sm:$0xff] %vm294_vm1, %v291_v34 }
 0x1b0   :  { %v292_v35 = vpop.f32.mrf.mxu2 }
 0x1b1   :  { %300 = vsyncpa [#allocation3], 1 }
 0x1b2   :  { %301 = vsyncpa [#allocation5], 1 }
 0x1b3   :  { %302 = vsyncpa [#allocation8], 1 }

</bundles_post_ra>
